<compile_context>
chip_gen: v7x
topology: tpu7x:2x2x1
jax: 0.10.0
libtpu: 0.0.40
codegen_flags: <defaults>
</compile_context>

<pallas_src>
import math
import functools

import jax
import jax.numpy as jnp
from jax import lax
from jax.experimental import pallas as pl
from jax.experimental.pallas import tpu as pltpu


# --------------------------------------------------------------------------
# Generation-aware VMEM budget & tiling helpers
# --------------------------------------------------------------------------

try:
    _VMEM_CAP = int(pltpu.get_tpu_info().vmem_capacity_bytes)
except Exception:                       # fall back to the smallest budget (v7x)
    _VMEM_CAP = 64 * 1024 * 1024

_VMEM_LIMIT = int(max(32 * 1024 * 1024,
                      min(_VMEM_CAP - 16 * 1024 * 1024, 100 * 1024 * 1024)))


def _cparams(dimension_semantics):
    return pltpu.CompilerParams(dimension_semantics=dimension_semantics,
                                vmem_limit_bytes=_VMEM_LIMIT)


def _tile_rows(dim, target):
    """Second-to-last block dim: multiple of 8 dividing dim, or the full dim."""
    t = min(target, dim)
    while t > 8:
        if dim % t == 0:
            return t
        t //= 2
    return t if dim % t == 0 else dim


def _tile_lanes(dim, target):
    """Last block dim: multiple of 128 dividing dim, or the full dim."""
    t = min(target, dim)
    while t >= 128:
        if dim % t == 0 and t % 128 == 0:
            return t
        t //= 2
    # TODO(synk): pad V / H to a multiple of 128 at real sizes so this never
    # falls back to a full (possibly VMEM-busting) dimension.
    return dim


# --------------------------------------------------------------------------
# Tiled dense: bf16 MXU matmul + bias [+ GELU], f32 VMEM accumulator.
# Row tile target 1024 => weights streamed ~once over the whole batch.
# --------------------------------------------------------------------------

def _dense_kernel(x_ref, w_ref, b_ref, o_ref, acc_ref, *, act):
    k = pl.program_id(2)

    @pl.when(k == 0)
    def _():
        acc_ref[...] = jnp.zeros_like(acc_ref)

    acc_ref[...] += jnp.dot(x_ref[...], w_ref[...],
                            preferred_element_type=jnp.float32)

    @pl.when(k == pl.num_programs(2) - 1)
    def _():
        y = acc_ref[...] + b_ref[...]
        if act == "gelu":
            # TODO(synk): HF RoBERTa uses exact (erf) GELU; tanh approximation used.
            y = jax.nn.gelu(y, approximate=True)
        o_ref[...] = y.astype(o_ref.dtype)


def dense(x, w, b, act="none", out_dtype=jnp.bfloat16):
    """x:(M,K) bf16 @ w:(K,N) bf16 + b:(N,) f32 -> (M,N), optional GELU."""
    M, K = x.shape
    N = w.shape[1]
    tm = _tile_rows(M, 1024)
    tn = _tile_lanes(N, 256)
    tk = _tile_lanes(K, 256)
    return pl.pallas_call(
        functools.partial(_dense_kernel, act=act),
        out_shape=jax.ShapeDtypeStruct((M, N), out_dtype),
        grid=(M // tm, N // tn, K // tk),
        in_specs=[
            pl.BlockSpec((tm, tk), lambda i, j, k: (i, k)),
            pl.BlockSpec((tk, tn), lambda i, j, k: (k, j)),
            pl.BlockSpec((1, tn), lambda i, j, k: (0, j)),
        ],
        out_specs=pl.BlockSpec((tm, tn), lambda i, j, k: (i, j)),
        scratch_shapes=[pltpu.VMEM((tm, tn), jnp.float32)],
        compiler_params=_cparams(("parallel", "parallel", "arbitrary")),
    )(x, w, b.reshape(1, N))


# --------------------------------------------------------------------------
# Dense (full-H output) fused with residual add + LayerNorm in the epilogue.
# Used for the attention output projection (wo) and the FFN down-proj (w2).
# --------------------------------------------------------------------------

def _dense_res_ln_kernel(x_ref, w_ref, b_ref, res_ref, g_ref, beta_ref,
                         o_ref, acc_ref, *, eps):
    k = pl.program_id(1)

    @pl.when(k == 0)
    def _():
        acc_ref[...] = jnp.zeros_like(acc_ref)

    acc_ref[...] += jnp.dot(x_ref[...], w_ref[...],
                            preferred_element_type=jnp.float32)

    @pl.when(k == pl.num_programs(1) - 1)
    def _():
        y = acc_ref[...] + b_ref[...] + res_ref[...].astype(jnp.float32)
        mean = jnp.mean(y, axis=-1, keepdims=True)
        yc = y - mean
        var = jnp.mean(yc * yc, axis=-1, keepdims=True)
        o_ref[...] = (yc * lax.rsqrt(var + eps) * g_ref[...]
                      + beta_ref[...]).astype(o_ref.dtype)


def dense_res_ln(x, w, b, res, g, beta, eps=1e-5, out_dtype=jnp.bfloat16):
    """LayerNorm(res + x @ w + b) with full-H output tile (LN needs the row)."""
    M, K = x.shape
    H = w.shape[1]
    tm = _tile_rows(M, 1024)
    tk = _tile_lanes(K, 256)
    return pl.pallas_call(
        functools.partial(_dense_res_ln_kernel, eps=eps),
        out_shape=jax.ShapeDtypeStruct((M, H), out_dtype),
        grid=(M // tm, K // tk),
        in_specs=[
            pl.BlockSpec((tm, tk), lambda i, k: (i, k)),
            pl.BlockSpec((tk, H), lambda i, k: (k, 0)),
            pl.BlockSpec((1, H), lambda i, k: (0, 0)),
            pl.BlockSpec((tm, H), lambda i, k: (i, 0)),
            pl.BlockSpec((1, H), lambda i, k: (0, 0)),
            pl.BlockSpec((1, H), lambda i, k: (0, 0)),
        ],
        out_specs=pl.BlockSpec((tm, H), lambda i, k: (i, 0)),
        scratch_shapes=[pltpu.VMEM((tm, H), jnp.float32)],
        compiler_params=_cparams(("parallel", "arbitrary")),
    )(x, w, b.reshape(1, H), res, g.reshape(1, H), beta.reshape(1, H))


# --------------------------------------------------------------------------
# Row-tiled LayerNorm (embedding LN only; per-layer LNs are fused above).
# --------------------------------------------------------------------------

def _ln_kernel(x_ref, g_ref, b_ref, o_ref, *, eps):
    x = x_ref[...].astype(jnp.float32)
    mean = jnp.mean(x, axis=-1, keepdims=True)
    xc = x - mean
    var = jnp.mean(xc * xc, axis=-1, keepdims=True)
    o_ref[...] = (xc * lax.rsqrt(var + eps) * g_ref[...] + b_ref[...]).astype(o_ref.dtype)


def layernorm(x, g, b, eps=1e-5, out_dtype=jnp.bfloat16):
    M, H = x.shape
    tm = _tile_rows(M, 1024)
    return pl.pallas_call(
        functools.partial(_ln_kernel, eps=eps),
        out_shape=jax.ShapeDtypeStruct((M, H), out_dtype),
        grid=(M // tm,),
        in_specs=[pl.BlockSpec((tm, H), lambda i: (i, 0)),
                  pl.BlockSpec((1, H), lambda i: (0, 0)),
                  pl.BlockSpec((1, H), lambda i: (0, 0))],
        out_specs=pl.BlockSpec((tm, H), lambda i: (i, 0)),
        compiler_params=_cparams(("parallel",)),
    )(x, g.reshape(1, H), b.reshape(1, H))


# --------------------------------------------------------------------------
# Causal self-attention.  Grid = (batch, head-groups); each step gets a
# lane-dense (L, hg*Dh) slab of q/k/v (hg chosen so hg*Dh is a multiple of 128
# when possible), loops over the heads of the group with static offsets and
# writes each head's context straight into its ctx slice (no concatenate).
# --------------------------------------------------------------------------

def _attention_kernel(q_ref, k_ref, v_ref, ctx_ref, *, hg, dh, scale):
    L = q_ref.shape[1]
    row = lax.broadcasted_iota(jnp.int32, (L, L), 0)
    col = lax.broadcasted_iota(jnp.int32, (L, L), 1)
    causal = col <= row
    neg = jnp.float32(-1e30)

    # TODO(synk): flash-style KV tiling (skip fully-masked blocks) for long L.
    for i in range(hg):
        sl = slice(i * dh, (i + 1) * dh)
        q = q_ref[0, :, sl] * scale                       # scale folded into q (bf16)
        k = k_ref[0, :, sl]
        v = v_ref[0, :, sl]
        s = lax.dot_general(q, k, dimension_numbers=(((1,), (1,)), ((), ())),
                            preferred_element_type=jnp.float32)      # (L, L) f32
        s = jnp.where(causal, s, neg)
        m = jnp.max(s, axis=-1, keepdims=True)
        p = jnp.exp(s - m)
        p = p * (1.0 / jnp.sum(p, axis=-1, keepdims=True))           # exact normalize
        ctx = jnp.dot(p.astype(jnp.bfloat16), v, preferred_element_type=jnp.float32)
        ctx_ref[0, :, sl] = ctx.astype(jnp.bfloat16)


def _head_group(n_heads, dh):
    """Smallest divisor hg of n_heads with hg*dh a multiple of 128, else all heads."""
    for hg in range(1, n_heads + 1):
        if n_heads % hg == 0 and (hg * dh) % 128 == 0:
            return hg
    return n_heads


def fused_attention(q, k, v, n_heads, dh, scale):
    """q,k,v: (B, L, H) bf16 -> ctx (B, L, H) bf16."""
    B, L, H = q.shape
    hg = _head_group(n_heads, dh)
    G = n_heads // hg
    hgd = hg * dh
    return pl.pallas_call(
        functools.partial(_attention_kernel, hg=hg, dh=dh, scale=scale),
        out_shape=jax.ShapeDtypeStruct((B, L, H), jnp.bfloat16),
        grid=(B, G),
        in_specs=[pl.BlockSpec((1, L, hgd), lambda b, g: (b, 0, g))] * 3,
        out_specs=pl.BlockSpec((1, L, hgd), lambda b, g: (b, 0, g)),
        compiler_params=_cparams(("parallel", "parallel")),
    )(q, k, v)


# --------------------------------------------------------------------------
# Fused tied lm_head + per-token NLL (vocab-tiled online logsumexp).
# Weight-stationary: tm covers N=B*L in 1-2 blocks so word_emb is read ~once.
# Logits are emitted bf16 (halves the dominant write stream); NLL is f32.
# --------------------------------------------------------------------------

def _lmhead_loss_kernel(h_ref, w_ref, lbl_ref, logits_ref, nll_ref,
                        m_sc, l_sc, t_sc, *, tv):
    j = pl.program_id(1)

    @pl.when(j == 0)
    def _():
        m_sc[...] = jnp.full_like(m_sc, -jnp.inf)
        l_sc[...] = jnp.zeros_like(l_sc)
        t_sc[...] = jnp.zeros_like(t_sc)

    # (tm, H) bf16 x (tv, H) bf16, contracting on H (word_emb consumed un-transposed).
    logits = lax.dot_general(h_ref[...], w_ref[...],
                             dimension_numbers=(((1,), (1,)), ((), ())),
                             preferred_element_type=jnp.float32)      # (tm, tv) f32
    logits_ref[...] = logits.astype(logits_ref.dtype)

    m_prev = m_sc[...]
    m_new = jnp.maximum(m_prev, jnp.max(logits, axis=-1, keepdims=True))
    l_sc[...] = (l_sc[...] * jnp.exp(m_prev - m_new)
                 + jnp.sum(jnp.exp(logits - m_new), axis=-1, keepdims=True))
    m_sc[...] = m_new

    cls = lax.broadcasted_iota(jnp.int32, logits.shape, 1) + j * tv
    t_sc[...] += jnp.sum(jnp.where(cls == lbl_ref[...], logits, 0.0),
                         axis=-1, keepdims=True)

    @pl.when(j == pl.num_programs(1) - 1)
    def _():
        nll_ref[...] = m_sc[...] + jnp.log(l_sc[...]) - t_sc[...]


def lm_head_and_nll(h, w_emb, labels):
    """h:(N,H) bf16, w_emb:(V,H) bf16, labels:(N,1) i32 -> logits (N,V) bf16, nll (N,1) f32."""
    N, H = h.shape
    V = w_emb.shape[0]
    tm = _tile_rows(N, 1024)          # weight-stationary: 1-2 passes over word_emb
    tv = _tile_lanes(V, 1024)
    return pl.pallas_call(
        functools.partial(_lmhead_loss_kernel, tv=tv),
        out_shape=(jax.ShapeDtypeStruct((N, V), jnp.bfloat16),
                   jax.ShapeDtypeStruct((N, 1), jnp.float32)),
        grid=(N // tm, V // tv),
        in_specs=[pl.BlockSpec((tm, H), lambda i, j: (i, 0)),
                  pl.BlockSpec((tv, H), lambda i, j: (j, 0)),
                  pl.BlockSpec((tm, 1), lambda i, j: (i, 0))],
        out_specs=(pl.BlockSpec((tm, tv), lambda i, j: (i, j)),
                   pl.BlockSpec((tm, 1), lambda i, j: (i, 0))),
        scratch_shapes=[pltpu.VMEM((tm, 1), jnp.float32)] * 3,
        compiler_params=_cparams(("parallel", "arbitrary")),
    )(h, w_emb, labels)


# --------------------------------------------------------------------------
# Model glue (parameter setup, embedding gather, masking)
# --------------------------------------------------------------------------

def init_params(key, *, vocab, hidden, n_layers, n_heads, intermediate, max_pos):
    std = 0.02
    keys = jax.random.split(key, 4 + n_layers)
    params = {
        # single bf16 embedding table: gather source AND tied lm_head weight.
        "word_emb": (jax.random.normal(keys[0], (vocab, hidden), jnp.float32) * std
                     ).astype(jnp.bfloat16),
        "pos_emb": jax.random.normal(keys[1], (max_pos, hidden), jnp.float32) * std,
        "type_emb": jax.random.normal(keys[2], (1, hidden), jnp.float32) * std,
        "emb_ln_g": jnp.ones((hidden,), jnp.float32),
        "emb_ln_b": jnp.zeros((hidden,), jnp.float32),
        "layers": [],
    }
    for li in range(n_layers):
        ks = jax.random.split(keys[4 + li], 4)
        layer = {
            "w_qkv": (jax.random.normal(ks[0], (hidden, 3 * hidden), jnp.float32) * std
                      ).astype(jnp.bfloat16),
            "b_qkv": jnp.zeros((3 * hidden,), jnp.float32),
            "wo": (jax.random.normal(ks[1], (hidden, hidden), jnp.float32) * std
                   ).astype(jnp.bfloat16),
            "bo": jnp.zeros((hidden,), jnp.float32),
            "ln1_g": jnp.ones((hidden,), jnp.float32),
            "ln1_b": jnp.zeros((hidden,), jnp.float32),
            "w1": (jax.random.normal(ks[2], (hidden, intermediate), jnp.float32) * std
                   ).astype(jnp.bfloat16),
            "b1": jnp.zeros((intermediate,), jnp.float32),
            "w2": (jax.random.normal(ks[3], (intermediate, hidden), jnp.float32) * std
                   ).astype(jnp.bfloat16),
            "b2": jnp.zeros((hidden,), jnp.float32),
            "ln2_g": jnp.ones((hidden,), jnp.float32),
            "ln2_b": jnp.zeros((hidden,), jnp.float32),
        }
        params["layers"].append(layer)
    return params


def decoder_forward(params, input_ids, n_heads):
    B, L = input_ids.shape
    H = params["word_emb"].shape[1]
    dh = H // n_heads
    scale = 1.0 / math.sqrt(dh)

    # Embedding gather + position/type add stays as thin JAX glue.
    emb = (params["word_emb"][input_ids].astype(jnp.float32)
           + params["pos_emb"][:L][None, :, :]
           + params["type_emb"][0][None, None, :])
    h = layernorm(emb.reshape(B * L, H), params["emb_ln_g"], params["emb_ln_b"])   # bf16

    past_key_values = []
    for layer in params["layers"]:
        x = h
        qkv = dense(x, layer["w_qkv"], layer["b_qkv"])              # (B*L, 3H) bf16
        q = qkv[:, :H].reshape(B, L, H)
        k = qkv[:, H:2 * H].reshape(B, L, H)
        v = qkv[:, 2 * H:].reshape(B, L, H)

        ctx = fused_attention(q, k, v, n_heads, dh, scale)          # (B, L, H) bf16
        h1 = dense_res_ln(ctx.reshape(B * L, H), layer["wo"], layer["bo"],
                          x, layer["ln1_g"], layer["ln1_b"])
        ff = dense(h1, layer["w1"], layer["b1"], act="gelu")
        h = dense_res_ln(ff, layer["w2"], layer["b2"],
                         h1, layer["ln2_g"], layer["ln2_b"])

        # HF past_key_values layout (B, NH, L, Dh); reshape/transpose as XLA glue.
        past_key_values.append(
            (k.reshape(B, L, n_heads, dh).transpose(0, 2, 1, 3),
             v.reshape(B, L, n_heads, dh).transpose(0, 2, 1, 3)))
    return h.reshape(B, L, H), tuple(past_key_values)


def unixcoder_lm_forward(params, input_ids, labels=None, pad_id=1, n_heads=4):
    B, L = input_ids.shape
    V, H = params["word_emb"].shape

    hidden_states, past_key_values = decoder_forward(params, input_ids, n_heads)
    h_flat = hidden_states.reshape(B * L, H)

    # Per-row shifted labels (row (b,t) scored against labels[b,t+1]); trailing
    # column is a dummy masked out below.
    if labels is not None:
        lbl_rows = jnp.concatenate(
            [labels[:, 1:], jnp.full((B, 1), pad_id, labels.dtype)], axis=1)
    else:
        lbl_rows = jnp.zeros((B, L), jnp.int32)
    lbl_flat = lbl_rows.reshape(B * L, 1).astype(jnp.int32)

    logits_flat, nll_flat = lm_head_and_nll(h_flat, params["word_emb"], lbl_flat)
    lm_logits = logits_flat.reshape(B, L, V)

    if labels is None:
        return lm_logits, past_key_values

    # loss: active = input_ids[...,1:] != 1, CrossEntropy(ignore_index=pad_id)
    nll = nll_flat.reshape(B, L)[:, :L - 1]
    active = input_ids[:, 1:] != 1
    valid = jnp.logical_and(active, labels[:, 1:] != pad_id)
    denom = jnp.maximum(jnp.sum(valid.astype(jnp.float32)), 1.0)
    loss = jnp.sum(jnp.where(valid, nll, 0.0)) / denom
    return loss, lm_logits, past_key_values


# --------------------------------------------------------------------------
# Main
# --------------------------------------------------------------------------

if __name__ == "__main__":
    B, L = 2, 8
    VOCAB, HIDDEN, N_LAYERS, N_HEADS, INTER, MAX_POS = 256, 32, 2, 4, 64, 64
    PAD_ID = 1

    root = jax.random.PRNGKey(0)
    kp, ki = jax.random.split(root)
    params = init_params(kp, vocab=VOCAB, hidden=HIDDEN, n_layers=N_LAYERS,
                         n_heads=N_HEADS, intermediate=INTER, max_pos=MAX_POS)

    input_ids = jax.random.randint(ki, (B, L), 2, VOCAB, dtype=jnp.int32)
    input_ids = input_ids.at[0, 6:].set(PAD_ID)   # some padding to exercise masking
    labels = input_ids                            # standard LM setup (shift inside)

    loss, lm_logits, past_key_values = unixcoder_lm_forward(
        params, input_ids, labels=labels, pad_id=PAD_ID, n_heads=N_HEADS)

    jax.block_until_ready((loss, lm_logits, past_key_values))
    assert lm_logits.shape == (B, L, VOCAB)
    assert len(past_key_values) == N_LAYERS
    assert past_key_values[0][0].shape == (B, N_HEADS, L, HIDDEN // N_HEADS)
    assert jnp.isfinite(loss)
    print("KERNEL_OK")
</pallas_src>

<mosaic_0001>
module attributes {stable_mosaic.version = 11 : i64} {
  func.func @_ln_kernel(%arg0: i32, %arg1: memref<16x32xf32, #tpu.memory_space<vmem>>, %arg2: memref<1x32xf32, #tpu.memory_space<vmem>>, %arg3: memref<1x32xf32, #tpu.memory_space<vmem>>, %arg4: memref<16x32xbf16, #tpu.memory_space<vmem>>) attributes {dimension_semantics = [#tpu.dimension_semantics<parallel>], iteration_bounds = array<i64: 1>, scalar_prefetch = 0 : i64, scratch_operands = 0 : i64, tpu.core_type = #tpu.core_type<tc>, window_params = [{transform_indices = @transform_0, window_bounds = array<i64: 16, 32>}, {pipeline_mode = #tpu.pipeline_mode<synchronous>, transform_indices = @transform_1, window_bounds = array<i64: 1, 32>}, {pipeline_mode = #tpu.pipeline_mode<synchronous>, transform_indices = @transform_2, window_bounds = array<i64: 1, 32>}, {transform_indices = @transform_3, window_bounds = array<i64: 16, 32>}]} {
    %c0 = arith.constant 0 : index
    %c0_0 = arith.constant 0 : index
    %0 = vector.load %arg1[%c0, %c0_0] : memref<16x32xf32, #tpu.memory_space<vmem>>, vector<16x32xf32>
    %cst = arith.constant dense<0.000000e+00> : vector<16xf32>
    %1 = vector.multi_reduction <add>, %0, %cst [1] : vector<16x32xf32> to vector<16xf32>
    %2 = vector.shape_cast %1 : vector<16xf32> to vector<16x1xf32>
    %cst_1 = arith.constant 3.200000e+01 : f32
    %3 = vector.broadcast %cst_1 : f32 to vector<16x1xf32>
    %4 = arith.divf %2, %3 : vector<16x1xf32>
    %5 = vector.broadcast %4 : vector<16x1xf32> to vector<16x32xf32>
    %6 = arith.subf %0, %5 : vector<16x32xf32>
    %7 = arith.mulf %6, %6 : vector<16x32xf32>
    %cst_2 = arith.constant dense<0.000000e+00> : vector<16xf32>
    %8 = vector.multi_reduction <add>, %7, %cst_2 [1] : vector<16x32xf32> to vector<16xf32>
    %9 = vector.shape_cast %8 : vector<16xf32> to vector<16x1xf32>
    %cst_3 = arith.constant 3.200000e+01 : f32
    %10 = vector.broadcast %cst_3 : f32 to vector<16x1xf32>
    %11 = arith.divf %9, %10 : vector<16x1xf32>
    %cst_4 = arith.constant 9.99999974E-6 : f32
    %12 = vector.broadcast %cst_4 : f32 to vector<16x1xf32>
    %13 = arith.addf %11, %12 : vector<16x1xf32>
    %14 = math.rsqrt %13 : vector<16x1xf32>
    %15 = vector.broadcast %14 : vector<16x1xf32> to vector<16x32xf32>
    %16 = arith.mulf %6, %15 : vector<16x32xf32>
    %c0_5 = arith.constant 0 : index
    %c0_6 = arith.constant 0 : index
    %17 = vector.load %arg2[%c0_5, %c0_6] : memref<1x32xf32, #tpu.memory_space<vmem>>, vector<1x32xf32>
    %18 = vector.broadcast %17 : vector<1x32xf32> to vector<16x32xf32>
    %19 = arith.mulf %16, %18 : vector<16x32xf32>
    %c0_7 = arith.constant 0 : index
    %c0_8 = arith.constant 0 : index
    %20 = vector.load %arg3[%c0_7, %c0_8] : memref<1x32xf32, #tpu.memory_space<vmem>>, vector<1x32xf32>
    %21 = vector.broadcast %20 : vector<1x32xf32> to vector<16x32xf32>
    %22 = arith.addf %19, %21 : vector<16x32xf32>
    %23 = arith.truncf %22 : vector<16x32xf32> to vector<16x32xbf16>
    %c0_9 = arith.constant 0 : index
    %c0_10 = arith.constant 0 : index
    %24 = vector.load %arg4[%c0_9, %c0_10] : memref<16x32xbf16, #tpu.memory_space<vmem>>, vector<16x32xbf16>
    tpu.vector_store %arg4[%c0_9, %c0_10], %23 {strides = array<i32>} : memref<16x32xbf16, #tpu.memory_space<vmem>>, vector<16x32xbf16>,
    return
  }
  func.func @transform_0(%arg0: i32) -> (i32, i32) {
    %c0_i32 = arith.constant 0 : i32
    %c0_i32_0 = arith.constant 0 : i32
    return %arg0, %c0_i32 : i32, i32
  }
  func.func @transform_1(%arg0: i32) -> (i32, i32) {
    %c0_i32 = arith.constant 0 : i32
    %c0_i32_0 = arith.constant 0 : i32
    %c0_i32_1 = arith.constant 0 : i32
    return %c0_i32, %c0_i32_0 : i32, i32
  }
  func.func @transform_2(%arg0: i32) -> (i32, i32) {
    %c0_i32 = arith.constant 0 : i32
    %c0_i32_0 = arith.constant 0 : i32
    %c0_i32_1 = arith.constant 0 : i32
    return %c0_i32, %c0_i32_0 : i32, i32
  }
  func.func @transform_3(%arg0: i32) -> (i32, i32) {
    %c0_i32 = arith.constant 0 : i32
    %c0_i32_0 = arith.constant 0 : i32
    return %arg0, %c0_i32 : i32, i32
  }
}

</mosaic_0001>

<bundles_post_ra>
// kernel: tpu_custom_call.1
= control target key start
LH: loop header
LB: loop body
LE: loop exit
PB: predicated region body
PF: predicated region fallthrough
CT: control target
= control target key end

     0   :  { %8 = vsyncpa [#allocation3], 0  ;;  %s229_s0 = inlined_call_operand.hbm [shape: f32[16,32], index: 0, kind: input, shape index: {}]   ;;  %s230_s1 = inlined_call_operand.vmem [shape: f32[1,32], index: 1, kind: input, shape index: {}]   ;;  %s231_s2 = inlined_call_operand.vmem [shape: f32[1,32], index: 2, kind: input, shape index: {}]   ;;  %s232_s3 = inlined_call_operand.hbm [shape: bf16[16,32], index: 3, kind: output, shape index: {}]  }
   0x1   :  { %9 = vsyncpa [#allocation4], 0  ;;  %s169_s12 = smov [#allocation2]   ;;  %s121_s16 = scalar_lea.hbm %s229_s0, 256 }
   0x2   :  { %s15_s13 = sshll.u32 %s169_s12, 4  ;;  %p122_p0 = scmp.ne.s32.totalorder %s229_s0, %s121_s16  ;;  %s16_s13 = int_to_ptr.vmem [resolvable:$true] %s15_s13 }
   0x3   :  { %p125_p1 = scmp.lt.u32.totalorder %s121_s16, %s229_s0 }
   0x5   :  { %p127_p2 = pnand %p125_p1, %p122_p0 }
   0x7   :  { %130 = shalt.err (!%p127_p2)
}
   0x8   :  { %s131_s21 = scalar_lea.vmem %s16_s13, 256  ;;  %p136_p4 = scmp.lt.s32.totalorder %s16_s13, %s16_s13 }
   0x9   :  { %p132_p3 = scmp.ne.s32.totalorder %s16_s13, %s131_s21  ;;  %p137_p5 = scmp.lt.s32.totalorder %s131_s21, %s131_s21 }
   0xb   :  { %p138_p6 = por %p137_p5, %p136_p4 }
   0xd   :  { %p139_p7 = pnand %p138_p6, %p132_p3 }
   0xf   :  { %142 = shalt.err (!%p139_p7)
}
  0x10   :  { %s170_s22 = smov 128   ;;  %s171_s23 = smov 8  }
  0x11   :  { %21 = dma.hbm_to_vmem [thread:$0]  %s229_s0, 256, %s16_s13, [#allocation3], %s170_s22, %s170_s22, %s171_s23  }
  0x12   :  { %165 = dma.done.wait [#allocation3], 256  }
  0x13   :  { %166 = vsyncadd [#allocation3], 4294967040  ;;  %vm31_vm0 = vcmask 261120   ;;  %v29_v0 = vld [vmem:[#allocation2] sm:$0xff]  ;;  %v30_v1 = vld [vmem:[#allocation2 + $0x8] sm:$0xff]  ;;  %vm85_vm1 = vcmask 257024  }
  0x14   :  { %v32_v2 = vsel %vm31_vm0, %v29_v0, 0.0  ;;  %v35_v3 = vsel %vm31_vm0, %v30_v1, 0.0  ;;  %v105_v21 = vld [vmem:[%s230_s1] ss:$0 sm:$0xff]  ;;  %s172_s29 = smov [#allocation5]  }
  0x15   :  { %33 = vadd.xlane.f32.xlu0 %v32_v2  ;;  %v106_v23 = vld [vmem:[%s231_s2] ss:$0 sm:$0xff]  ;;  %s93_s30 = sshll.u32 %s172_s29, 4  ;;  %s94_s30 = int_to_ptr.vmem [resolvable:$true] %s93_s30 }
  0x16   :  { %s143_s1 = scalar_lea.vmem %s94_s30, 128  ;;  %p148_p9 = scmp.lt.s32.totalorder %s94_s30, %s94_s30 }
  0x17   :  { %p144_p8 = scmp.ne.s32.totalorder %s94_s30, %s143_s1  ;;  %p149_p10 = scmp.lt.s32.totalorder %s143_s1, %s143_s1 }
  0x19   :  { %36 = vadd.xlane.f32.xlu0 %v35_v3  ;;  %p150_p11 = por %p149_p10, %p148_p9 }
  0x1b   :  { %p151_p12 = pnand %p150_p11, %p144_p8 }
  0xa2   :  { %v34_v4 = vpop.xlane.xlu0 %33 }
  0xa3   :  { %v39_v5 = vmul.f32 0.03125, %v34_v4 }
  0xa5   :  { %v41_v6 = vsub.f32 %v29_v0, %v39_v5 }
  0xa6   :  { %v37_v7 = vpop.xlane.xlu0 %36 }
  0xa7   :  { %v40_v8 = vmul.f32 0.03125, %v37_v7  ;;  %v43_v9 = vmul.f32 %v41_v6, %v41_v6 }
  0xa9   :  { %v42_v10 = vsub.f32 %v30_v1, %v40_v8  ;;  %v45_v11 = vsel %vm31_vm0, %v43_v9, 0.0 }
  0xaa   :  { %46 = vadd.xlane.f32.xlu1 %v45_v11 }
  0xab   :  { %v44_v12 = vmul.f32 %v42_v10, %v42_v10 }
  0xad   :  { %v48_v13 = vsel %vm31_vm0, %v44_v12, 0.0 }
  0xae   :  { %49 = vadd.xlane.f32.xlu1 %v48_v13 }
 0x137   :  { %v47_v14 = vpop.xlane.xlu1 %46 }
 0x138   :  { %v51_v15 = vmul.f32 0.03125, %v47_v14 }
 0x13a   :  { %v53_v16 = vadd.f32 1e-05, %v51_v15 }
 0x13b   :  { %v50_v17 = vpop.xlane.xlu1 %49 }
 0x13c   :  { %117 = vrsqrt.f32 %v53_v16  ;;  %v52_v18 = vmul.f32 0.03125, %v50_v17 }
 0x13e   :  { %v54_v19 = vadd.f32 1e-05, %v52_v18 }
 0x140   :  { %119 = vrsqrt.f32 %v54_v19 }
 0x146   :  { %v118_v20 = vpop.eup %117 }
 0x147   :  { %v57_v22 = vmul.f32 %v118_v20, %v41_v6 }
 0x149   :  { %v66_v24 = vmul.f32 %v105_v21, %v57_v22 }
 0x14a   :  { %v120_v25 = vpop.eup %119 }
 0x14b   :  { %v58_v26 = vmul.f32 %v120_v25, %v42_v10  ;;  %v75_v27 = vadd.f32 %v106_v23, %v66_v24 }
 0x14d   :  { %v67_v28 = vmul.f32 %v105_v21, %v58_v26  ;;  %v109_v29 = vpack.c.bf16 %v75_v27, %v75_v27 }
 0x14f   :  { %v76_v30 = vadd.f32 %v106_v23, %v67_v28  ;;  %86 = vst.msk [vmem:[#allocation5] sm:$0xf] %vm85_vm1, %v109_v29 }
 0x151   :  { %v110_v31 = vpack.c.bf16 %v76_v30, %v76_v30 }
 0x153   :  { %87 = vst.msk [vmem:[#allocation5 + $0x4] sm:$0xf] %vm85_vm1, %v110_v31 }
 0x154   :  { %154 = shalt.err (!%p151_p12)
}
 0x155   :  { %s155_s5 = scalar_lea.hbm %s232_s3, 128 }
 0x156   :  { %p156_p13 = scmp.ne.s32.totalorder %s232_s3, %s155_s5  ;;  %p159_p0 = scmp.lt.u32.totalorder %s155_s5, %s232_s3 }
 0x158   :  { %p161_p1 = pnand %p159_p0, %p156_p13 }
 0x15a   :  { %164 = shalt.err (!%p161_p1)
}
 0x15b   :  { %s173_s10 = smov 64   ;;  %s174_s11 = smov 4  }
 0x15c   :  { %99 = dma.vmem_to_hbm [thread:$0]  %s94_s30, 128, %s232_s3, [#allocation4], %s173_s10, %s173_s10, %s174_s11  }
 0x15d   :  { %167 = dma.done.wait [#allocation4], 128  }
 0x15e   :  { %168 = vsyncadd [#allocation4], 4294967168 }
 0x15f   :  { %103 = vsyncpa [#allocation3], 1 }
 0x160   :  { %104 = vsyncpa [#allocation4], 1 }

</bundles_post_ra>
